<compile_context>
chip_gen: v5e
topology: v5e:2x2
jax: 0.10.0
libtpu: 0.0.40
codegen_flags: <defaults>
</compile_context>

<pallas_src>
import functools

import jax
import jax.numpy as jnp
from jax import lax
from jax.experimental import pallas as pl
from jax.experimental.pallas import tpu as pltpu

_LANES = 128


def _vmem_budget_bytes():
    """Return (tile_budget, vmem_limit) from the physical VMEM of this TPU
    generation (64 MiB/TC on v7x, 128 MiB on v5e/v6e).  Conservative fallback."""
    cap = 64 * 1024 * 1024  # v7x per-core physical -- safe lower bound
    try:
        info = pltpu.get_tpu_info()
        cap = int(getattr(info, "vmem_capacity_bytes", cap)) or cap
    except Exception:
        pass
    budget = (cap * 3) // 4                    # tiles + temporaries <= 3/4 physical
    vmem_limit = min(budget + (8 << 20), cap)  # scoped limit with headroom
    return budget, vmem_limit


def _ce_kernel_lanes(x_ref, t_ref, out_ref, *, hw, need_mask):
    """Fast path (H*W multiple of 128).
    x_ref: (C, TS, 128) logits; t_ref: (TS, 128) target; out_ref: (TS, 128) f32 acc."""
    j = pl.program_id(2)

    @pl.when(j == 0)
    def _():
        out_ref[...] = jnp.zeros_like(out_ref)

    x = x_ref[...].astype(jnp.float32)            # (C, TS, 128), cast in-register
    t = t_ref[...].astype(jnp.float32)            # (TS, 128)

    # Class reduction over the leading axis: pure vreg-aligned VPU ops.
    m = jnp.max(x, axis=0, keepdims=True)         # (1, TS, 128)
    lse = m + jnp.log(jnp.sum(jnp.exp(x - m), axis=0, keepdims=True))
    # sum_c log_softmax = sum_c (x_c - lse); avoids sum_x - C*lse cancellation.
    slog = jnp.sum(x - lse, axis=0)               # (TS, 128)
    per_item = -t * slog                          # (TS, 128)

    if need_mask:
        p = pl.program_id(1)
        blk = p * pl.num_programs(2) + j
        ts, lanes = per_item.shape
        rem = hw - blk * (ts * lanes)
        row = lax.broadcasted_iota(jnp.int32, (ts, lanes), 0)
        col = lax.broadcasted_iota(jnp.int32, (ts, lanes), 1)
        per_item = jnp.where(row * lanes + col < rem, per_item, 0.0)

    out_ref[...] += per_item


def _ce_kernel_flat(x_ref, t_ref, out_ref, *, hw, tw, need_mask):
    """Fallback path (H*W not a multiple of 128).
    x_ref: (C, TW); t_ref: (1, TW); out_ref: (1, TW) f32 accumulator."""
    j = pl.program_id(1)

    @pl.when(j == 0)
    def _():
        out_ref[...] = jnp.zeros_like(out_ref)

    x = x_ref[...].astype(jnp.float32)
    t = t_ref[...].astype(jnp.float32)

    m = jnp.max(x, axis=0, keepdims=True)
    lse = m + jnp.log(jnp.sum(jnp.exp(x - m), axis=0, keepdims=True))
    slog = jnp.sum(x - lse, axis=0, keepdims=True)       # (1, TW)
    per_item = -t * slog

    if need_mask:
        col = lax.broadcasted_iota(jnp.int32, per_item.shape, 1)
        per_item = jnp.where(col < (hw - j * tw), per_item, 0.0)

    out_ref[...] += per_item


def cross_entropy_loss(x_nchw, target_nhw):
    """x_nchw: (N, C, H, W) logits (any float dtype); target_nhw: (N, H, W)
    (int or float).  Returns scalar mean loss (float32), matching PyTorch."""
    N, C, H, W = x_nchw.shape
    HW = H * W
    xsz = jnp.dtype(x_nchw.dtype).itemsize
    tsz = jnp.dtype(target_nhw.dtype).itemsize
    budget, vmem_limit = _vmem_budget_bytes()

    cost = pl.CostEstimate(
        flops=6 * N * C * HW + 2 * N * HW,
        transcendentals=N * C * HW + N * HW,
        bytes_accessed=N * C * HW * xsz + N * HW * tsz + N * HW * 4,
    )
    cparams = dict(vmem_limit_bytes=vmem_limit)

    if HW % _LANES == 0:
        # ---- fast path: (N, C, S, 128) view, class axis leading ----
        S = HW // _LANES
        # Per row of 128 lanes: 2 x-buffers + 2 t-buffers + accumulator, plus
        # ~3 f32 copies of the x row for elementwise/reduction temporaries.
        per_row = _LANES * (2 * C * xsz + 3 * C * 4 + 2 * tsz + 3 * 4)
        ts_budget = budget // per_row
        if ts_budget >= S or S <= 8:
            ts = S
        else:
            ts = max(8, min((ts_budget // 8) * 8, (S // 8) * 8))
        num_blocks = -(-S // ts)                 # cdiv
        need_mask = (S % ts) != 0
        # v7x megacore: if N alone cannot occupy both TensorCores, split the
        # spatial blocks into 2 parallel stripes (no phantom blocks: even split).
        P = 2 if (N % 2 == 1 and num_blocks >= 2 and num_blocks % 2 == 0) else 1
        J = num_blocks // P

        x4 = x_nchw.reshape(N, C, S, _LANES)       # free reshape of NCHW data
        t4 = target_nhw.reshape(N, 1, S, _LANES)   # native dtype through the DMA

        partial = pl.pallas_call(
            functools.partial(_ce_kernel_lanes, hw=HW, need_mask=need_mask),
            out_shape=jax.ShapeDtypeStruct((N, P, ts, _LANES), jnp.float32),
            grid_spec=pltpu.PrefetchScalarGridSpec(
                num_scalar_prefetch=0,
                grid=(N, P, J),
                in_specs=[
                    pl.BlockSpec((None, C, ts, _LANES),
                                 lambda n, p, j: (n, 0, p * J + j, 0)),
                    pl.BlockSpec((None, None, ts, _LANES),
                                 lambda n, p, j: (n, 0, p * J + j, 0)),
                ],
                out_specs=pl.BlockSpec((None, None, ts, _LANES),
                                       lambda n, p, j: (n, p, 0, 0)),
            ),
            compiler_params=pltpu.CompilerParams(
                dimension_semantics=("parallel", "parallel", "arbitrary"),
                **cparams),
            cost_estimate=cost,
        )(x4, t4)
    else:
        # ---- fallback: (N, C, HW) view, class axis on sublanes, masked tail ----
        num128 = -(-HW // _LANES)
        cpad = ((C + 7) // 8) * 8                # sublane padding of the x tile
        per_col = _LANES * (2 * cpad * xsz + 3 * cpad * 4 + 16 * tsz + 24 * 4)
        cols = max(budget // per_col, 1)
        if cols >= num128:
            tw = HW                              # single block == full extent
        else:
            tw = cols * _LANES                   # lane-dense multiple of 128
        J = -(-HW // tw)
        need_mask = (HW % tw) != 0

        x3 = x_nchw.reshape(N, C, HW)
        t3 = target_nhw.reshape(N, 1, HW)

        partial = pl.pallas_call(
            functools.partial(_ce_kernel_flat, hw=HW, tw=tw, need_mask=need_mask),
            out_shape=jax.ShapeDtypeStruct((N, 1, tw), jnp.float32),
            grid_spec=pltpu.PrefetchScalarGridSpec(
                num_scalar_prefetch=0,
                grid=(N, J),
                in_specs=[
                    pl.BlockSpec((None, C, tw), lambda n, j: (n, 0, j)),
                    pl.BlockSpec((None, 1, tw), lambda n, j: (n, 0, j)),
                ],
                out_specs=pl.BlockSpec((None, 1, tw), lambda n, j: (n, 0, 0)),
            ),
            compiler_params=pltpu.CompilerParams(
                dimension_semantics=("parallel", "arbitrary"), **cparams),
            cost_estimate=cost,
        )(x3, t3)

    # Tiny lane-dense finish outside the kernel (also better summation order).
    return jnp.sum(partial) / jnp.float32(N * HW)


def _reference(x_nchw, target_nhw):
    """Plain-JAX reference matching PyTorch CrossEntropyLoss with prob targets."""
    logp = jax.nn.log_softmax(x_nchw.astype(jnp.float32), axis=1)   # (N,C,H,W)
    t = target_nhw.astype(jnp.float32)[:, None, :, :]               # (N,1,H,W)
    t = jnp.broadcast_to(t, x_nchw.shape)                           # expand over C
    per_item = -jnp.sum(t * logp, axis=1)                           # (N,H,W)
    return jnp.mean(per_item)


if __name__ == "__main__":
    key = jax.random.PRNGKey(0)
    k1, k2 = jax.random.split(key)

    N, C, H, W = 2, 4, 16, 16
    x = jax.random.normal(k1, (N, C, H, W), dtype=jnp.float32)
    # original target is a class-index map (N, H, W); the module casts it to float
    target = jax.random.randint(k2, (N, H, W), 0, C, dtype=jnp.int32)

    loss_fn = jax.jit(cross_entropy_loss)
    loss = jax.block_until_ready(loss_fn(x, target))

    ref = jax.block_until_ready(_reference(x, target))
    assert jnp.allclose(loss, ref, rtol=1e-5, atol=1e-5), (loss, ref)

    print("KERNEL_OK")
</pallas_src>

<mosaic_0001>
module attributes {stable_mosaic.version = 11 : i64} {
  func.func @_ce_kernel_lanes(%arg0: i32, %arg1: i32, %arg2: i32, %arg3: memref<1x4x2x128xf32, #tpu.memory_space<vmem>>, %arg4: memref<1x1x2x128xi32, #tpu.memory_space<vmem>>, %arg5: memref<1x1x2x128xf32, #tpu.memory_space<vmem>>) attributes {dimension_semantics = [#tpu.dimension_semantics<parallel>, #tpu.dimension_semantics<parallel>, #tpu.dimension_semantics<arbitrary>], iteration_bounds = array<i64: 2, 1, 1>, scalar_prefetch = 0 : i64, scratch_operands = 0 : i64, tpu.core_type = #tpu.core_type<tc>, window_params = [{transform_indices = @transform_0, window_bounds = array<i64: 1, 4, 2, 128>}, {transform_indices = @transform_1, window_bounds = array<i64: 1, 1, 2, 128>}, {transform_indices = @transform_2, window_bounds = array<i64: 1, 1, 2, 128>}]} {
    %c0_i32 = arith.constant 0 : i32
    %0 = arith.cmpi eq, %arg2, %c0_i32 : i32
    %1 = arith.extui %0 : i1 to i32
    %c0_i32_0 = arith.constant 0 : i32
    %2 = arith.cmpi ne, %1, %c0_i32_0 : i32
    scf.if %2 {
      %cst_19 = arith.constant 0.000000e+00 : f32
      %29 = vector.broadcast %cst_19 : f32 to vector<2x128xf32>
      %c0_20 = arith.constant 0 : index
      %c0_21 = arith.constant 0 : index
      %c0_22 = arith.constant 0 : index
      %c0_23 = arith.constant 0 : index
      %30 = vector.load %arg5[%c0_20, %c0_21, %c0_22, %c0_23] : memref<1x1x2x128xf32, #tpu.memory_space<vmem>>, vector<1x1x2x128xf32>
      %31 = vector.shape_cast %30 : vector<1x1x2x128xf32> to vector<2x128xf32>
      %32 = vector.shape_cast %29 : vector<2x128xf32> to vector<1x1x2x128xf32>
      tpu.vector_store %arg5[%c0_20, %c0_21, %c0_22, %c0_23], %32 {strides = array<i32>} : memref<1x1x2x128xf32, #tpu.memory_space<vmem>>, vector<1x1x2x128xf32>,
    } else {
    }
    %c0 = arith.constant 0 : index
    %c0_1 = arith.constant 0 : index
    %c0_2 = arith.constant 0 : index
    %c0_3 = arith.constant 0 : index
    %3 = vector.load %arg3[%c0, %c0_1, %c0_2, %c0_3] : memref<1x4x2x128xf32, #tpu.memory_space<vmem>>, vector<1x4x2x128xf32>
    %4 = vector.shape_cast %3 : vector<1x4x2x128xf32> to vector<4x2x128xf32>
    %c0_4 = arith.constant 0 : index
    %c0_5 = arith.constant 0 : index
    %c0_6 = arith.constant 0 : index
    %c0_7 = arith.constant 0 : index
    %5 = vector.load %arg4[%c0_4, %c0_5, %c0_6, %c0_7] : memref<1x1x2x128xi32, #tpu.memory_space<vmem>>, vector<1x1x2x128xi32>
    %6 = vector.shape_cast %5 : vector<1x1x2x128xi32> to vector<2x128xi32>
    %7 = arith.sitofp %6 : vector<2x128xi32> to vector<2x128xf32>
    %cst = arith.constant dense<0xFF800000> : vector<2x128xf32>
    %8 = vector.multi_reduction <maximumf>, %4, %cst [0] : vector<4x2x128xf32> to vector<2x128xf32>
    %9 = vector.shape_cast %8 : vector<2x128xf32> to vector<1x2x128xf32>
    %10 = vector.broadcast %9 : vector<1x2x128xf32> to vector<4x2x128xf32>
    %11 = arith.subf %4, %10 : vector<4x2x128xf32>
    %12 = math.exp %11 : vector<4x2x128xf32>
    %cst_8 = arith.constant dense<0.000000e+00> : vector<2x128xf32>
    %13 = vector.multi_reduction <add>, %12, %cst_8 [0] : vector<4x2x128xf32> to vector<2x128xf32>
    %14 = vector.shape_cast %13 : vector<2x128xf32> to vector<1x2x128xf32>
    %15 = math.log %14 : vector<1x2x128xf32>
    %16 = arith.addf %9, %15 : vector<1x2x128xf32>
    %17 = vector.broadcast %16 : vector<1x2x128xf32> to vector<4x2x128xf32>
    %18 = arith.subf %4, %17 : vector<4x2x128xf32>
    %cst_9 = arith.constant dense<0.000000e+00> : vector<2x128xf32>
    %19 = vector.multi_reduction <add>, %18, %cst_9 [0] : vector<4x2x128xf32> to vector<2x128xf32>
    %cst_10 = arith.constant 0.000000e+00 : f32
    %20 = vector.broadcast %cst_10 : f32 to vector<2x128xf32>
    %21 = arith.subf %20, %7 : vector<2x128xf32>
    %22 = arith.mulf %21, %19 : vector<2x128xf32>
    %c0_11 = arith.constant 0 : index
    %c0_12 = arith.constant 0 : index
    %c0_13 = arith.constant 0 : index
    %c0_14 = arith.constant 0 : index
    %23 = vector.load %arg5[%c0_11, %c0_12, %c0_13, %c0_14] : memref<1x1x2x128xf32, #tpu.memory_space<vmem>>, vector<1x1x2x128xf32>
    %24 = vector.shape_cast %23 : vector<1x1x2x128xf32> to vector<2x128xf32>
    %25 = arith.addf %24, %22 : vector<2x128xf32>
    %c0_15 = arith.constant 0 : index
    %c0_16 = arith.constant 0 : index
    %c0_17 = arith.constant 0 : index
    %c0_18 = arith.constant 0 : index
    %26 = vector.load %arg5[%c0_15, %c0_16, %c0_17, %c0_18] : memref<1x1x2x128xf32, #tpu.memory_space<vmem>>, vector<1x1x2x128xf32>
    %27 = vector.shape_cast %26 : vector<1x1x2x128xf32> to vector<2x128xf32>
    %28 = vector.shape_cast %25 : vector<2x128xf32> to vector<1x1x2x128xf32>
    tpu.vector_store %arg5[%c0_15, %c0_16, %c0_17, %c0_18], %28 {strides = array<i32>} : memref<1x1x2x128xf32, #tpu.memory_space<vmem>>, vector<1x1x2x128xf32>,
    return
  }
  func.func @transform_0(%arg0: i32, %arg1: i32, %arg2: i32) -> (i32, i32, i32, i32) {
    %c1_i32 = arith.constant 1 : i32
    %0 = arith.muli %arg1, %c1_i32 : i32
    %1 = arith.addi %0, %arg2 : i32
    %c0_i32 = arith.constant 0 : i32
    %c0_i32_0 = arith.constant 0 : i32
    %c0_i32_1 = arith.constant 0 : i32
    return %arg0, %c0_i32, %1, %c0_i32_0 : i32, i32, i32, i32
  }
  func.func @transform_1(%arg0: i32, %arg1: i32, %arg2: i32) -> (i32, i32, i32, i32) {
    %c1_i32 = arith.constant 1 : i32
    %0 = arith.muli %arg1, %c1_i32 : i32
    %1 = arith.addi %0, %arg2 : i32
    %c0_i32 = arith.constant 0 : i32
    %c0_i32_0 = arith.constant 0 : i32
    %c0_i32_1 = arith.constant 0 : i32
    return %arg0, %c0_i32, %1, %c0_i32_0 : i32, i32, i32, i32
  }
  func.func @transform_2(%arg0: i32, %arg1: i32, %arg2: i32) -> (i32, i32, i32, i32) {
    %c0_i32 = arith.constant 0 : i32
    %c0_i32_0 = arith.constant 0 : i32
    %c0_i32_1 = arith.constant 0 : i32
    return %arg0, %arg1, %c0_i32, %c0_i32_0 : i32, i32, i32, i32
  }
}

</mosaic_0001>

<bundles_post_ra>
// kernel: cross_entropy_loss.1
= control target key start
LH: loop header
LB: loop body
LE: loop exit
PB: predicated region body
PF: predicated region fallthrough
CT: control target
= control target key end

     0   :  { %s461_s9 = smov 0   ;;  %s463_s10 = smov 0   ;;  %s522_s0 = inlined_call_operand.vmem [shape: f32[2,4,2,128], index: 0, kind: input, shape index: {}]   ;;  %s523_s1 = inlined_call_operand.vmem [shape: s32[2,1,2,128], index: 1, kind: input, shape index: {}]   ;;  %s524_s2 = inlined_call_operand.vmem [shape: f32[2,1,2,128], index: 2, kind: output, shape index: {}]  }
   0x1   :  { %s465_s11 = smov 0  }
   0x2 LB: > { %s31_s12 = sadd.s32 1, %s439_s10  ;;  %p378_p0 = scmp.ge.s32.totalorder %s443_s11, 1  ;;  %s443_s11 = sphi %s465_s11, %s12_s11   ;;  %s439_s10 = sphi %s463_s10, %s526_s10   ;;  %s435_s9 = sphi %s461_s9, %s525_s9  }
   0x3   : > { %p33_p1 = scmp.ge.s32.totalorder %s31_s12, 2  ;;  %p160_p2 = scmp.lt.s32.totalorder %s443_s11, 3 }
   0x5   : > { %s528_s12 = smov (%p33_p1, %s31_s12), 0  ;;  %p161_p3 = pnand %p378_p0, %p160_p2 }
   0x6   : > { %p197_p4 = scmp.lt.s32.totalorder (!%p161_p3), %s435_s9, 1 }
   0x7   : > { %164 = sbr.rel (%p161_p3) target bundleno = 66 (0x42), region = 28 }
   0xc   : > { %s530_s9 = smov (!%p197_p4, %s435_s9), 1  ;;  %vm233_vm0 = vcmask 1041408   ;;  %v445_v3 = vmov 0.0  }
   0xd   : > { %s385_s13 = sshll.u32 %s530_s9, 3  ;;  %s381_s14 = sshll.u32 %s530_s9, 1 }
   0xe   : > { %s204_s17 = scalar_lea.vmem %s522_s0, %s385_s13  ;;  %s491_s20 = scalar_lea.vmem %s524_s2, %s381_s14 }
   0xf   : > { %v227_v0 = vld [vmem:[%s204_s17] sm:$0x3]  ;;  %v228_v1 = vld [vmem:[%s204_s17 + $0x2] sm:$0x3]  ;;  %v229_v2 = vld [vmem:[%s204_s17 + $0x4] sm:$0x3]  ;;  %s213_s23 = scalar_lea.vmem %s523_s1, %s381_s14 }
  0x10   : > { %226 = vst [vmem:[%s491_s20] sm:$0x3] %v445_v3  ;;  %v230_v4 = vld [vmem:[%s204_s17 + $0x6] sm:$0x3]  ;;  %v234_v5 = vsel %vm233_vm0, %v227_v0, -inf  ;;  %v235_v6 = vsel %vm233_vm0, %v228_v1, -inf  ;;  %v236_v7 = vsel %vm233_vm0, %v229_v2, -inf }
  0x11   : > { %v237_v8 = vsel %vm233_vm0, %v230_v4, -inf  ;;  %v238_v9 = vmax.f32 %v234_v5, %v235_v6  ;;  %v231_v33 = vld [vmem:[%s213_s23] sm:$0x3] }
  0x12   : > { %v239_v10 = vmax.f32 %v236_v7, %v237_v8  ;;  %v232_v39 = vcvt.s32.f32 %v231_v33 }
  0x14   : > { %v240_v11 = vmax.f32 %v238_v9, %v239_v10  ;;  %v274_v45 = vsub.f32 0.0, %v232_v39 }
  0x16   : > { %v241_v12 = vsub.f32 %v227_v0, %v240_v11  ;;  %v242_v13 = vsub.f32 %v228_v1, %v240_v11  ;;  %v243_v14 = vsub.f32 %v229_v2, %v240_v11  ;;  %v244_v15 = vsub.f32 %v230_v4, %v240_v11 }
  0x17   : > { %v276_v48 = vld [vmem:[%s491_s20] sm:$0x3] }
  0x18   : > { %v245_v16 = vmul.f32 1.442695, %v241_v12  ;;  %v247_v17 = vmul.f32 1.442695, %v242_v13  ;;  %v249_v18 = vmul.f32 1.442695, %v243_v14 }
  0x19   : > { %v251_v19 = vmul.f32 1.442695, %v244_v15 }
  0x1a   : > { %411 = vpow2.f32 %v245_v16 }
  0x1b   : > { %413 = vpow2.f32 %v247_v17 }
  0x1c   : > { %415 = vpow2.f32 %v249_v18 }
  0x1d   : > { %417 = vpow2.f32 %v251_v19 }
  0x20   : > { %v412_v20 = vpop.eup %411 }
  0x21   : > { %v414_v21 = vpop.eup %413  ;;  %v253_v22 = vsel %vm233_vm0, %v412_v20, 0.0 }
  0x22   : > { %v416_v23 = vpop.eup %415  ;;  %v254_v24 = vsel %vm233_vm0, %v414_v21, 0.0 }
  0x23   : > { %v418_v25 = vpop.eup %417  ;;  %v255_v26 = vadd.f32 %v254_v24, %v253_v22  ;;  %v256_v27 = vsel %vm233_vm0, %v416_v23, 0.0 }
  0x24   : > { %v258_v28 = vsel %vm233_vm0, %v418_v25, 0.0 }
  0x25   : > { %v257_v29 = vadd.f32 %v256_v27, %v255_v26 }
  0x27   : > { %v259_v30 = vadd.f32 %v258_v28, %v257_v29 }
  0x29   : > { %419 = vlog2.f32 %v259_v30 }
  0x2f   : > { %v420_v31 = vpop.eup %419 }
  0x30   : > { %v261_v32 = vmul.f32 0.6931472, %v420_v31 }
  0x32   : > { %v262_v34 = vadd.f32 %v261_v32, %v240_v11 }
  0x34   : > { %v263_v35 = vsub.f32 %v227_v0, %v262_v34  ;;  %v264_v36 = vsub.f32 %v228_v1, %v262_v34  ;;  %v265_v37 = vsub.f32 %v229_v2, %v262_v34  ;;  %v266_v38 = vsub.f32 %v230_v4, %v262_v34 }
  0x36   : > { %v267_v40 = vsel %vm233_vm0, %v263_v35, 0.0  ;;  %v268_v41 = vsel %vm233_vm0, %v264_v36, 0.0  ;;  %v270_v42 = vsel %vm233_vm0, %v265_v37, 0.0  ;;  %v272_v44 = vsel %vm233_vm0, %v266_v38, 0.0 }
  0x37   : > { %v269_v43 = vadd.f32 %v268_v41, %v267_v40 }
  0x39   : > { %v271_v46 = vadd.f32 %v270_v42, %v269_v43 }
  0x3b   : > { %v273_v47 = vadd.f32 %v272_v44, %v271_v46 }
  0x3d   : > { %v275_v49 = vmul.f32 %v274_v45, %v273_v47 }
  0x3f   : > { %v277_v50 = vadd.f32 %v276_v48, %v275_v49 }
  0x41   : > { %278 = vst [vmem:[%s491_s20] sm:$0x3] %v277_v50 }
  0x42 PF: > { %s12_s11 = sadd.s32 1, %s443_s11   ;;  %s525_s9 = smov %s439_s10 }
  0x43   : > { %p9_p5 = scmp.ge.s32.totalorder %s12_s11, 4   ;;  %s526_s10 = smov %s528_s12 }
  0x45   :  { %11 = sbr.rel (!%p9_p5) target bundleno = 2 (0x2), region = 65 }

</bundles_post_ra>
